<compile_context>
chip_gen: v7x
topology: tpu7x:2x2x1
jax: 0.10.0
libtpu: 0.0.40
codegen_flags: <defaults>
</compile_context>

<pallas_src>
import functools

import jax
import jax.numpy as jnp
from jax.experimental import pallas as pl
from jax.experimental.pallas import tpu as pltpu

HIDDEN = 256
_LANES = 128  # batch sits on the lane axis -> tiles are multiples of 128


def _round_up(x, m):
    return (x + m - 1) // m * m


def _choose_tile(batch, block_b):
    """Pick (b_tile, b_pad): bound padding waste, prefer >=2 grid steps."""
    n_tiles = max(pl.cdiv(batch, block_b), 2 if batch > _LANES else 1)
    b_tile = _round_up(pl.cdiv(batch, n_tiles), _LANES)
    return b_tile, b_tile * n_tiles


def critic_kernel(x_ref, w1_ref, b1_ref, w2_ref, b2_ref, w3_ref, b3_ref, o_ref):
    # Activations are feature-major: features on sublanes, batch on lanes.
    # ---- layer 1: [H, d_in] @ [d_in, bt] -> [H, bt]  (torch.cat fused away) --
    h = jnp.dot(w1_ref[...], x_ref[...], preferred_element_type=jnp.float32)
    # fused f32 bias + ReLU + bf16 downcast (single live copy of h1)
    h = jnp.maximum(h + b1_ref[...], 0.0).astype(w2_ref.dtype)
    # ---- layer 2: [H, H] @ [H, bt] -> [H, bt] --------------------------------
    h = jnp.dot(w2_ref[...], h, preferred_element_type=jnp.float32)
    h = jnp.maximum(h + b2_ref[...], 0.0)                      # f32 elementwise
    # ---- layer 3: [1, H] @ [H, bt] -> lane-dense [1, bt] Q row ---------------
    q = jnp.dot(w3_ref[...], h, preferred_element_type=jnp.float32)
    o_ref[...] = q + b3_ref[0, 0]


def prepare_params(params):
    """One-time layout/precision prep (do NOT redo per forward call):
    transpose weights to the feature-major (W^T) form, cast MXU operands to
    bf16, keep VPU-side tensors (biases, w3 row) in f32."""
    w1, b1, w2, b2, w3, b3 = params
    return (
        w1.T.astype(jnp.bfloat16),               # [256, sd+ad]
        b1.reshape(-1, 1).astype(jnp.float32),   # [256, 1]   column bias
        w2.T.astype(jnp.bfloat16),               # [256, 256]
        b2.reshape(-1, 1).astype(jnp.float32),   # [256, 1]   column bias
        w3.T.astype(jnp.float32),                # [1, 256]   row for final layer
        b3.reshape(1, 1).astype(jnp.float32),    # [1, 1]  -> SMEM scalar
    )


@functools.partial(jax.jit, static_argnames=("block_b", "vmem_limit_bytes"))
def critic_forward(state, action, prepared, block_b=4096, vmem_limit_bytes=None):
    """state: [B, state_dim], action: [B, action_dim] -> Q: [B, 1] (f32)."""
    w1t, b1, w2t, b2, w3, b3 = prepared
    B = state.shape[0]
    d_in = state.shape[1] + action.shape[1]
    H = w2t.shape[0]

    b_tile, b_pad = _choose_tile(B, block_b)

    # Lane-dense, feature-major activation slab: [d_in, B] bf16, batch on lanes.
    # (the fused torch.cat + transpose; bf16 halves the stream — the f32->bf16
    #  input cast costs ~2e-2 relative tolerance on Q.)
    x = jnp.concatenate([state, action], axis=1).astype(jnp.bfloat16).T
    if b_pad != B:
        x = jnp.pad(x, ((0, 0), (0, b_pad - B)))

    grid = (b_pad // b_tile,)
    const = lambda shape: pl.BlockSpec(shape, lambda i: (0, 0))  # VMEM-resident

    out = pl.pallas_call(
        critic_kernel,
        out_shape=jax.ShapeDtypeStruct((1, b_pad), jnp.float32),
        grid=grid,
        in_specs=[
            pl.BlockSpec((d_in, b_tile), lambda i: (0, i)),     # activation tile
            const((H, d_in)),                                   # w1^T
            const((H, 1)),                                      # b1 column
            const((H, H)),                                      # w2^T
            const((H, 1)),                                      # b2 column
            const((1, H)),                                      # w3 row
            pl.BlockSpec(memory_space=pltpu.MemorySpace.SMEM),  # b3 scalar
        ],
        out_specs=pl.BlockSpec((1, b_tile), lambda i: (0, i)),  # lane-dense Q row
        compiler_params=pltpu.CompilerParams(
            dimension_semantics=("parallel",),      # megacore-shardable on v7x
            vmem_limit_bytes=vmem_limit_bytes,      # raise for b_tile>4096 (v6e)
        ),
    )(x, w1t, b1, w2t, b2, w3, b3)

    # drop padded batch lanes (they hold garbage Q values) and restore [B, 1]
    return out[0, :B].reshape(B, 1)


def init_params(key, state_dim, action_dim, hidden=HIDDEN):
    """Deterministic init matching PyTorch Linear default (U(-1/sqrt(fan_in), +))."""
    d_in = state_dim + action_dim
    dims = [(d_in, hidden), (hidden, hidden), (hidden, 1)]
    params = []
    for fan_in, fan_out in dims:
        key, kw, kb = jax.random.split(key, 3)
        bound = 1.0 / jnp.sqrt(fan_in)
        w = jax.random.uniform(kw, (fan_in, fan_out), jnp.float32, -bound, bound)
        b = jax.random.uniform(kb, (1, fan_out), jnp.float32, -bound, bound)
        params += [w, b]
    return tuple(params)


def critic_ref(state, action, params):
    """Pure-JAX f32 reference (mirrors the PyTorch module)."""
    w1, b1, w2, b2, w3, b3 = params
    x = jnp.concatenate([state, action], axis=1)
    h1 = jnp.maximum(x @ w1 + b1, 0.0)
    h2 = jnp.maximum(h1 @ w2 + b2, 0.0)
    return h2 @ w3 + b3


if __name__ == "__main__":
    STATE_DIM, ACTION_DIM = 12, 4
    key = jax.random.PRNGKey(0)
    kp, ks, ka = jax.random.split(key, 3)

    params = init_params(kp, STATE_DIM, ACTION_DIM)
    prepared = prepare_params(params)

    ok = True
    # small batch (single tile) and a batch that exercises multi-step grid +
    # lane padding + the output slice.
    for b in (8, 384):
        ks, k1, k2 = jax.random.split(ks, 3)
        state = jax.random.normal(k1, (b, STATE_DIM), jnp.float32)
        action = jax.random.normal(k2, (b, ACTION_DIM), jnp.float32)

        out = critic_forward(state, action, prepared)
        jax.block_until_ready(out)

        ref = critic_ref(state, action, params)
        assert out.shape == (b, 1)
        # bf16 matmul operands (f32 accumulation) -> looser tolerance than f32.
        ok &= bool(jnp.allclose(out, ref, atol=2e-2, rtol=2e-2))
        assert ok, float(jnp.max(jnp.abs(out - ref)))

    print("KERNEL_OK")
</pallas_src>

<mosaic_0001>
module attributes {stable_mosaic.version = 11 : i64} {
  func.func @critic_kernel(%arg0: i32, %arg1: memref<16x128xbf16, #tpu.memory_space<vmem>>, %arg2: memref<256x16xbf16, #tpu.memory_space<vmem>>, %arg3: memref<256x1xf32, #tpu.memory_space<vmem>>, %arg4: memref<256x256xbf16, #tpu.memory_space<vmem>>, %arg5: memref<256x1xf32, #tpu.memory_space<vmem>>, %arg6: memref<1x256xf32, #tpu.memory_space<vmem>>, %arg7: memref<1x1xf32, #tpu.memory_space<smem>>, %arg8: memref<1x128xf32, #tpu.memory_space<vmem>>) attributes {dimension_semantics = [#tpu.dimension_semantics<parallel>], iteration_bounds = array<i64: 1>, scalar_prefetch = 0 : i64, scratch_operands = 0 : i64, tpu.core_type = #tpu.core_type<tc>, window_params = [{transform_indices = @transform_0, window_bounds = array<i64: 16, 128>}, {pipeline_mode = #tpu.pipeline_mode<synchronous>, transform_indices = @transform_1, window_bounds = array<i64: 256, 16>}, {pipeline_mode = #tpu.pipeline_mode<synchronous>, transform_indices = @transform_2, window_bounds = array<i64: 256, 1>}, {pipeline_mode = #tpu.pipeline_mode<synchronous>, transform_indices = @transform_3, window_bounds = array<i64: 256, 256>}, {pipeline_mode = #tpu.pipeline_mode<synchronous>, transform_indices = @transform_4, window_bounds = array<i64: 256, 1>}, {pipeline_mode = #tpu.pipeline_mode<synchronous>, transform_indices = @transform_5, window_bounds = array<i64: 1, 256>}, {transform_indices = @transform_6, window_bounds = array<i64: 1, 1>}, {transform_indices = @transform_7, window_bounds = array<i64: 1, 128>}]} {
    %c0 = arith.constant 0 : index
    %c0_0 = arith.constant 0 : index
    %0 = vector.load %arg2[%c0, %c0_0] : memref<256x16xbf16, #tpu.memory_space<vmem>>, vector<256x16xbf16>
    %c0_1 = arith.constant 0 : index
    %c0_2 = arith.constant 0 : index
    %1 = vector.load %arg1[%c0_1, %c0_2] : memref<16x128xbf16, #tpu.memory_space<vmem>>, vector<16x128xbf16>
    %cst = arith.constant dense<0.000000e+00> : vector<256x128xf32>
    %2 = tpu.matmul %0, %1, %cst {dimension_numbers = #tpu.dot_dimension_numbers<[1], [0], [0], [1], [0, 0, 1, 1], [], []>} : vector<256x16xbf16>, vector<16x128xbf16>, vector<256x128xf32> -> vector<256x128xf32>
    %c0_3 = arith.constant 0 : index
    %c0_4 = arith.constant 0 : index
    %3 = vector.load %arg3[%c0_3, %c0_4] : memref<256x1xf32, #tpu.memory_space<vmem>>, vector<256x1xf32>
    %4 = vector.broadcast %3 : vector<256x1xf32> to vector<256x128xf32>
    %5 = arith.addf %2, %4 : vector<256x128xf32>
    %cst_5 = arith.constant 0.000000e+00 : f32
    %6 = vector.broadcast %cst_5 : f32 to vector<256x128xf32>
    %7 = arith.maximumf %5, %6 : vector<256x128xf32>
    %8 = arith.truncf %7 : vector<256x128xf32> to vector<256x128xbf16>
    %c0_6 = arith.constant 0 : index
    %c0_7 = arith.constant 0 : index
    %9 = vector.load %arg4[%c0_6, %c0_7] : memref<256x256xbf16, #tpu.memory_space<vmem>>, vector<256x256xbf16>
    %cst_8 = arith.constant dense<0.000000e+00> : vector<256x128xf32>
    %10 = tpu.matmul %9, %8, %cst_8 {dimension_numbers = #tpu.dot_dimension_numbers<[1], [0], [0], [1], [0, 0, 1, 1], [], []>} : vector<256x256xbf16>, vector<256x128xbf16>, vector<256x128xf32> -> vector<256x128xf32>
    %c0_9 = arith.constant 0 : index
    %c0_10 = arith.constant 0 : index
    %11 = vector.load %arg5[%c0_9, %c0_10] : memref<256x1xf32, #tpu.memory_space<vmem>>, vector<256x1xf32>
    %12 = vector.broadcast %11 : vector<256x1xf32> to vector<256x128xf32>
    %13 = arith.addf %10, %12 : vector<256x128xf32>
    %cst_11 = arith.constant 0.000000e+00 : f32
    %14 = vector.broadcast %cst_11 : f32 to vector<256x128xf32>
    %15 = arith.maximumf %13, %14 : vector<256x128xf32>
    %c0_12 = arith.constant 0 : index
    %c0_13 = arith.constant 0 : index
    %16 = vector.load %arg6[%c0_12, %c0_13] : memref<1x256xf32, #tpu.memory_space<vmem>>, vector<1x256xf32>
    %cst_14 = arith.constant dense<0.000000e+00> : vector<1x128xf32>
    %17 = tpu.matmul %16, %15, %cst_14 {dimension_numbers = #tpu.dot_dimension_numbers<[1], [0], [0], [1], [0, 0, 1, 1], [], []>} : vector<1x256xf32>, vector<256x128xf32>, vector<1x128xf32> -> vector<1x128xf32>
    %c0_15 = arith.constant 0 : index
    %c0_16 = arith.constant 0 : index
    %18 = memref.load %arg7[%c0_15, %c0_16] : memref<1x1xf32, #tpu.memory_space<smem>>
    %19 = vector.broadcast %18 : f32 to vector<1x128xf32>
    %20 = arith.addf %17, %19 : vector<1x128xf32>
    %c0_17 = arith.constant 0 : index
    %c0_18 = arith.constant 0 : index
    %21 = vector.load %arg8[%c0_17, %c0_18] : memref<1x128xf32, #tpu.memory_space<vmem>>, vector<1x128xf32>
    tpu.vector_store %arg8[%c0_17, %c0_18], %20 {strides = array<i32>} : memref<1x128xf32, #tpu.memory_space<vmem>>, vector<1x128xf32>,
    return
  }
  func.func @transform_0(%arg0: i32) -> (i32, i32) {
    %c0_i32 = arith.constant 0 : i32
    %c0_i32_0 = arith.constant 0 : i32
    return %c0_i32, %arg0 : i32, i32
  }
  func.func @transform_1(%arg0: i32) -> (i32, i32) {
    %c0_i32 = arith.constant 0 : i32
    %c0_i32_0 = arith.constant 0 : i32
    %c0_i32_1 = arith.constant 0 : i32
    return %c0_i32, %c0_i32_0 : i32, i32
  }
  func.func @transform_2(%arg0: i32) -> (i32, i32) {
    %c0_i32 = arith.constant 0 : i32
    %c0_i32_0 = arith.constant 0 : i32
    %c0_i32_1 = arith.constant 0 : i32
    return %c0_i32, %c0_i32_0 : i32, i32
  }
  func.func @transform_3(%arg0: i32) -> (i32, i32) {
    %c0_i32 = arith.constant 0 : i32
    %c0_i32_0 = arith.constant 0 : i32
    %c0_i32_1 = arith.constant 0 : i32
    return %c0_i32, %c0_i32_0 : i32, i32
  }
  func.func @transform_4(%arg0: i32) -> (i32, i32) {
    %c0_i32 = arith.constant 0 : i32
    %c0_i32_0 = arith.constant 0 : i32
    %c0_i32_1 = arith.constant 0 : i32
    return %c0_i32, %c0_i32_0 : i32, i32
  }
  func.func @transform_5(%arg0: i32) -> (i32, i32) {
    %c0_i32 = arith.constant 0 : i32
    %c0_i32_0 = arith.constant 0 : i32
    %c0_i32_1 = arith.constant 0 : i32
    return %c0_i32, %c0_i32_0 : i32, i32
  }
  func.func @transform_6(%arg0: i32) -> (i32, i32) {
    %c0_i32 = arith.constant 0 : i32
    %c0_i32_0 = arith.constant 0 : i32
    %c0_i32_1 = arith.constant 0 : i32
    return %c0_i32, %c0_i32_0 : i32, i32
  }
  func.func @transform_7(%arg0: i32) -> (i32, i32) {
    %c0_i32 = arith.constant 0 : i32
    %c0_i32_0 = arith.constant 0 : i32
    return %c0_i32, %arg0 : i32, i32
  }
}

</mosaic_0001>

<bundles_post_ra>
// kernel: critic_forward.1
= control target key start
LH: loop header
LB: loop body
LE: loop exit
PB: predicated region body
PF: predicated region fallthrough
CT: control target
= control target key end

     0   :  { %v1643_v0 = vmov 0   ;;  %vm340_vm0 = vcmask 130048   ;;  %s2221_s2 = inlined_call_operand.vmem [shape: f32[256,1], index: 2, kind: input, shape index: {}]   ;;  %s2222_s0 = inlined_call_operand.vmem [shape: bf16[16,128], index: 0, kind: input, shape index: {}]   ;;  %s2223_s1 = inlined_call_operand.vmem [shape: bf16[256,16], index: 1, kind: input, shape index: {}]   ;;  %s2224_s4 = inlined_call_operand.vmem [shape: f32[256,1], index: 4, kind: input, shape index: {}]   ;;  %s2225_s3 = inlined_call_operand.vmem [shape: bf16[256,256], index: 3, kind: input, shape index: {}]   ;;  %s2226_s5 = inlined_call_operand.vmem [shape: f32[1,256], index: 5, kind: input, shape index: {}]   ;;  %s2227_s6 = inlined_call_operand.<no memory space> [shape: f32[1,1], index: 6, kind: input, shape index: {}]   ;;  %s2228_s7 = inlined_call_operand.vmem [shape: f32[1,128], index: 7, kind: output, shape index: {}]  }
   0x1   :  { %1577 = vset.pattern.permute.xlu1 %v1643_v0  ;;  %1576 = vset.pattern.permute.xlu0 %v1643_v0  ;;  %v78_v1 = vld [vmem:[%s2221_s2 + $0x80] sm:$0xff]  ;;  %v79_v4 = vld [vmem:[%s2221_s2 + $0x88] sm:$0xff]  ;;  %v80_v8 = vld [vmem:[%s2221_s2 + $0x90] sm:$0xff] }
   0x2   :  { %v62_v2 = vld [vmem:[%s2221_s2] sm:$0xff]  ;;  %176 = vperm.xlu0 %1576, %v78_v1   ;;  %v63_v5 = vld [vmem:[%s2221_s2 + $0x8] sm:$0xff]  ;;  %v81_v9 = vld [vmem:[%s2221_s2 + $0x98] sm:$0xff] }
   0x3   :  { %96 = vperm.xlu1 %1577, %v62_v2   ;;  %v1578_v3 = vld [vmem:[%s2222_s0] sm:$0xff]   ;;  %v1580_v7 = vld [vmem:[%s2223_s1 + $0x8] sm:$0xff]   ;;  %v1581_v10 = vld [vmem:[%s2223_s1 + $0x10] sm:$0xff]  }
   0x4   :  { %1493 = vmatprep.subr.bf16.mxu0 %v1578_v3  ;;  %v1579_v6 = vld [vmem:[%s2223_s1] sm:$0xff]   ;;  %v64_v11 = vld [vmem:[%s2221_s2 + $0x10] sm:$0xff]  ;;  %v65_v12 = vld [vmem:[%s2221_s2 + $0x18] sm:$0xff] }
   0x5   :  { %1494 = vmatpush3.bf16.msra.mxu0 %v1578_v3  ;;  %1495 = vmatprep.mubr.msk.bf16.mxu0 %vm340_vm0, %v1579_v6  ;;  %v1582_v13 = vld [vmem:[%s2223_s1 + $0x18] sm:$0xff]   ;;  %v1583_v14 = vld [vmem:[%s2223_s1 + $0x20] sm:$0xff]   ;;  %v83_v16 = vld [vmem:[%s2221_s2 + $0xa8] sm:$0xff] }
   0x6   :  { %181 = vperm.xlu0 %1576, %v79_v4   ;;  %v82_v15 = vld [vmem:[%s2221_s2 + $0xa0] sm:$0xff]  ;;  %v67_v18 = vld [vmem:[%s2221_s2 + $0x28] sm:$0xff]  ;;  %v1585_v20 = vld [vmem:[%s2223_s1 + $0x30] sm:$0xff]  }
   0x7   :  { %101 = vperm.xlu1 %1577, %v63_v5   ;;  %v66_v17 = vld [vmem:[%s2221_s2 + $0x20] sm:$0xff]  ;;  %v1584_v19 = vld [vmem:[%s2223_s1 + $0x28] sm:$0xff]   ;;  %v84_v21 = vld [vmem:[%s2221_s2 + $0xb0] sm:$0xff] }
   0x8   :  { %1496 = vmatmul.mubr.msk.bf16.vlgmr.msra.gmra.mrb[0].mxu0 %vm340_vm0, %v1580_v7  ;;  %v85_v22 = vld [vmem:[%s2221_s2 + $0xb8] sm:$0xff]  ;;  %v68_v23 = vld [vmem:[%s2221_s2 + $0x30] sm:$0xff]  ;;  %v1587_v26 = vld [vmem:[%s2223_s1 + $0x40] sm:$0xff]  }
   0x9   :  { %1499 = vmatprep.mubr.msk.bf16.mxu0 %vm340_vm0, %v1581_v10  ;;  %v69_v24 = vld [vmem:[%s2221_s2 + $0x38] sm:$0xff]  ;;  %v86_v27 = vld [vmem:[%s2221_s2 + $0xc0] sm:$0xff]  ;;  %v87_v28 = vld [vmem:[%s2221_s2 + $0xc8] sm:$0xff] }
   0xa   :  { %186 = vperm.xlu0 %1576, %v80_v8   ;;  %v1586_v25 = vld [vmem:[%s2223_s1 + $0x38] sm:$0xff]   ;;  %v70_v29 = vld [vmem:[%s2221_s2 + $0x40] sm:$0xff]  ;;  %v71_v30 = vld [vmem:[%s2221_s2 + $0x48] sm:$0xff] }
   0xb   :  { %191 = vperm.xlu1 %1577, %v81_v9   ;;  %v1588_v31 = vld [vmem:[%s2223_s1 + $0x48] sm:$0xff]   ;;  %v1589_v32 = vld [vmem:[%s2223_s1 + $0x50] sm:$0xff]   ;;  %v89_v34 = vld [vmem:[%s2221_s2 + $0xd8] sm:$0xff] }
   0xc   :  { %v88_v33 = vld [vmem:[%s2221_s2 + $0xd0] sm:$0xff]  ;;  %v73_v36 = vld [vmem:[%s2221_s2 + $0x58] sm:$0xff]  ;;  %v1591_v38 = vld [vmem:[%s2223_s1 + $0x60] sm:$0xff]  }
   0xd   :  { %v72_v35 = vld [vmem:[%s2221_s2 + $0x50] sm:$0xff]  ;;  %v1590_v37 = vld [vmem:[%s2223_s1 + $0x58] sm:$0xff]   ;;  %v90_v39 = vld [vmem:[%s2221_s2 + $0xe0] sm:$0xff] }
   0xe   :  { %106 = vperm.xlu0 %1576, %v64_v11   ;;  %v91_v40 = vld [vmem:[%s2221_s2 + $0xe8] sm:$0xff]  ;;  %v74_v41 = vld [vmem:[%s2221_s2 + $0x60] sm:$0xff]  ;;  %v1593_v44 = vld [vmem:[%s2223_s1 + $0x70] sm:$0xff]  }
   0xf   :  { %111 = vperm.xlu1 %1577, %v65_v12   ;;  %v75_v42 = vld [vmem:[%s2221_s2 + $0x68] sm:$0xff]  ;;  %v92_v45 = vld [vmem:[%s2221_s2 + $0xf0] sm:$0xff]  ;;  %v93_v46 = vld [vmem:[%s2221_s2 + $0xf8] sm:$0xff] }
  0x10   :  { %1500 = vmatmul.mubr.msk.bf16.gmra.mrb[4].mxu0 %vm340_vm0, %v1582_v13  ;;  %v1592_v43 = vld [vmem:[%s2223_s1 + $0x68] sm:$0xff]   ;;  %v76_v47 = vld [vmem:[%s2221_s2 + $0x70] sm:$0xff]  ;;  %v77_v48 = vld [vmem:[%s2221_s2 + $0x78] sm:$0xff] }
  0x11   :  { %1503 = vmatprep.mubr.msk.bf16.mxu0 %vm340_vm0, %v1583_v14  ;;  %v1594_v49 = vld [vmem:[%s2223_s1 + $0x78] sm:$0xff]   ;;  %v646_v50 = vld [vmem:[%s2224_s4 + $0x80] sm:$0xff]  ;;  %v647_v51 = vld [vmem:[%s2224_s4 + $0x88] sm:$0xff] }
  0x12   :  { %196 = vperm.xlu0 %1576, %v82_v15   ;;  %v630_v52 = vld [vmem:[%s2224_s4] sm:$0xff]  ;;  %v631_v53 = vld [vmem:[%s2224_s4 + $0x8] sm:$0xff]  ;;  %v648_v54 = vld [vmem:[%s2224_s4 + $0x90] sm:$0xff] }
  0x13   :  { %201 = vperm.xlu1 %1577, %v83_v16   ;;  %v649_v55 = vld [vmem:[%s2224_s4 + $0x98] sm:$0xff]  ;;  %v632_v56 = vld [vmem:[%s2224_s4 + $0x10] sm:$0xff]  ;;  %v650_v58 = vld [vmem:[%s2224_s4 + $0xa0] sm:$0xff] }
  0x14   :  { %v633_v57 = vld [vmem:[%s2224_s4 + $0x18] sm:$0xff]  ;;  %v651_v59 = vld [vmem:[%s2224_s4 + $0xa8] sm:$0xff]  ;;  %v634_v60 = vld [vmem:[%s2224_s4 + $0x20] sm:$0xff] }
  0x15   :  { %v635_v61 = vld [vmem:[%s2224_s4 + $0x28] sm:$0xff]  ;;  %v652_v62 = vld [vmem:[%s2224_s4 + $0xb0] sm:$0xff]  ;;  %v653_v63 = vld [vmem:[%s2224_s4 + $0xb8] sm:$0xff] }
  0x16   :  { %116 = vperm.xlu0 %1576, %v66_v17   ;;  %v636_v0 = vld [vmem:[%s2224_s4 + $0x30] sm:$0xff]  ;;  %v637_v1 = vld [vmem:[%s2224_s4 + $0x38] sm:$0xff]  ;;  %v654_v2 = vld [vmem:[%s2224_s4 + $0xc0] sm:$0xff] }
  0x17   :  { %121 = vperm.xlu1 %1577, %v67_v18   ;;  %v655_v3 = vld [vmem:[%s2224_s4 + $0xc8] sm:$0xff]  ;;  %v638_v4 = vld [vmem:[%s2224_s4 + $0x40] sm:$0xff]  ;;  %v656_v6 = vld [vmem:[%s2224_s4 + $0xd0] sm:$0xff] }
  0x18   :  { %1504 = vmatmul.mubr.msk.bf16.gmra.mrb[8].mxu0 %vm340_vm0, %v1584_v19  ;;  %v639_v5 = vld [vmem:[%s2224_s4 + $0x48] sm:$0xff]  ;;  %v657_v7 = vld [vmem:[%s2224_s4 + $0xd8] sm:$0xff]  ;;  %v640_v8 = vld [vmem:[%s2224_s4 + $0x50] sm:$0xff] }
  0x19   :  { %1507 = vmatprep.mubr.msk.bf16.mxu0 %vm340_vm0, %v1585_v20  ;;  %v641_v9 = vld [vmem:[%s2224_s4 + $0x58] sm:$0xff]  ;;  %v658_v10 = vld [vmem:[%s2224_s4 + $0xe0] sm:$0xff]  ;;  %v659_v11 = vld [vmem:[%s2224_s4 + $0xe8] sm:$0xff] }
  0x1a   :  { %206 = vperm.xlu0 %1576, %v84_v21   ;;  %v642_v12 = vld [vmem:[%s2224_s4 + $0x60] sm:$0xff]  ;;  %v643_v13 = vld [vmem:[%s2224_s4 + $0x68] sm:$0xff]  ;;  %v660_v14 = vld [vmem:[%s2224_s4 + $0xf0] sm:$0xff] }
  0x1b   :  { %211 = vperm.xlu1 %1577, %v85_v22   ;;  %v661_v15 = vld [vmem:[%s2224_s4 + $0xf8] sm:$0xff]  ;;  %v644_v16 = vld [vmem:[%s2224_s4 + $0x70] sm:$0xff]  ;;  %v1597_v22 = vld [vmem:[%s2225_s3 + $0x4] ss:$8 sps:$4 sm:$0xff]  }
  0x1c   :  { %v645_v17 = vld [vmem:[%s2224_s4 + $0x78] sm:$0xff] }
  0x1e   :  { %126 = vperm.xlu0 %1576, %v68_v23   ;;  %v1600_v23 = vld [vmem:[%s2225_s3 + $0x54] ss:$8 sps:$4 sm:$0xff]  }
  0x1f   :  { %131 = vperm.xlu1 %1577, %v69_v24   ;;  %1054 = vmatprep.mubr.bf16.mxu1 %v1600_v23 }
  0x20   :  { %1508 = vmatmul.mubr.msk.bf16.gmra.mrb[12].mxu0 %vm340_vm0, %v1586_v25 }
  0x21   :  { %1511 = vmatprep.mubr.msk.bf16.mxu0 %vm340_vm0, %v1587_v26 }
  0x22   :  { %216 = vperm.xlu0 %1576, %v86_v27  }
  0x23   :  { %221 = vperm.xlu1 %1577, %v87_v28  }
  0x26   :  { %136 = vperm.xlu0 %1576, %v70_v29  }
  0x27   :  { %141 = vperm.xlu1 %1577, %v71_v30  }
  0x28   :  { %1512 = vmatmul.mubr.msk.bf16.gmra.mrb[16].mxu0 %vm340_vm0, %v1588_v31 }
  0x29   :  { %1515 = vmatprep.mubr.msk.bf16.mxu0 %vm340_vm0, %v1589_v32 }
  0x2a   :  { %226 = vperm.xlu0 %1576, %v88_v33  }
  0x2b   :  { %231 = vperm.xlu1 %1577, %v89_v34  }
  0x2e   :  { %146 = vperm.xlu0 %1576, %v72_v35  }
  0x2f   :  { %151 = vperm.xlu1 %1577, %v73_v36  }
  0x30   :  { %1516 = vmatmul.mubr.msk.bf16.gmra.mrb[20].mxu0 %vm340_vm0, %v1590_v37 }
  0x31   :  { %1519 = vmatprep.mubr.msk.bf16.mxu0 %vm340_vm0, %v1591_v38 }
  0x32   :  { %236 = vperm.xlu0 %1576, %v90_v39  }
  0x33   :  { %241 = vperm.xlu1 %1577, %v91_v40  }
  0x36   :  { %156 = vperm.xlu0 %1576, %v74_v41  }
  0x37   :  { %161 = vperm.xlu1 %1577, %v75_v42  }
  0x38   :  { %1520 = vmatmul.mubr.msk.bf16.gmra.mrb[24].mxu0 %vm340_vm0, %v1592_v43 }
  0x39   :  { %1523 = vmatprep.mubr.msk.bf16.mxu0 %vm340_vm0, %v1593_v44 }
  0x3a   :  { %246 = vperm.xlu0 %1576, %v92_v45  }
  0x3b   :  { %251 = vperm.xlu1 %1577, %v93_v46  }
  0x3e   :  { %166 = vperm.xlu0 %1576, %v76_v47  }
  0x3f   :  { %171 = vperm.xlu1 %1577, %v77_v48  }
  0x40   :  { %1524 = vmatmul.mubr.msk.bf16.gmra.mrb[28].mxu0 %vm340_vm0, %v1594_v49 }
  0x41   :  { %1014 = vmatprep.mubr.bf16.mxu0 %v1597_v22 }
  0x42   :  { %744 = vperm.xlu0 %1576, %v646_v50  }
  0x43   :  { %749 = vperm.xlu1 %1577, %v647_v51  }
  0x46   :  { %664 = vperm.xlu0 %1576, %v630_v52  }
  0x47   :  { %669 = vperm.xlu1 %1577, %v631_v53  }
  0x4a   :  { %754 = vperm.xlu0 %1576, %v648_v54  }
  0x4b   :  { %759 = vperm.xlu1 %1577, %v649_v55  }
  0x4e   :  { %674 = vperm.xlu0 %1576, %v632_v56  }
  0x4f   :  { %679 = vperm.xlu1 %1577, %v633_v57  }
  0x52   :  { %764 = vperm.xlu0 %1576, %v650_v58  }
  0x53   :  { %769 = vperm.xlu1 %1577, %v651_v59  }
  0x56   :  { %684 = vperm.xlu0 %1576, %v634_v60  }
  0x57   :  { %689 = vperm.xlu1 %1577, %v635_v61  }
  0x5a   :  { %774 = vperm.xlu0 %1576, %v652_v62  }
  0x5b   :  { %779 = vperm.xlu1 %1577, %v653_v63  }
  0x5e   :  { %694 = vperm.xlu0 %1576, %v636_v0  }
  0x5f   :  { %699 = vperm.xlu1 %1577, %v637_v1  }
  0x62   :  { %784 = vperm.xlu0 %1576, %v654_v2  }
  0x63   :  { %789 = vperm.xlu1 %1577, %v655_v3  }
  0x66   :  { %704 = vperm.xlu0 %1576, %v638_v4  }
  0x67   :  { %709 = vperm.xlu1 %1577, %v639_v5  }
  0x6a   :  { %794 = vperm.xlu0 %1576, %v656_v6  }
  0x6b   :  { %799 = vperm.xlu1 %1577, %v657_v7  }
  0x6e   :  { %714 = vperm.xlu0 %1576, %v640_v8  }
  0x6f   :  { %719 = vperm.xlu1 %1577, %v641_v9  }
  0x72   :  { %804 = vperm.xlu0 %1576, %v658_v10  }
  0x73   :  { %809 = vperm.xlu1 %1577, %v659_v11  }
  0x76   :  { %724 = vperm.xlu0 %1576, %v642_v12  }
  0x77   :  { %729 = vperm.xlu1 %1577, %v643_v13  }
  0x7a   :  { %814 = vperm.xlu0 %1576, %v660_v14  }
  0x7b   :  { %819 = vperm.xlu1 %1577, %v661_v15  }
  0x7e   :  { %734 = vperm.xlu0 %1576, %v644_v16  }
  0x7f   :  { %739 = vperm.xlu1 %1577, %v645_v17  }
  0x81   :  { %v1943_v18 = vpop.permute.xlu0 %176 }
  0x82   :  { %v97_v19 = vpop.permute.xlu1 %96 }
  0x85   :  { %v1945_v20 = vpop.permute.xlu0 %181 }
  0x86   :  { %v102_v21 = vpop.permute.xlu1 %101 }
  0x89   :  { %v1953_v24 = vpop.permute.xlu0 %186 }
  0x8a   :  { %v1955_v25 = vpop.permute.xlu1 %191 }
  0x8d   :  { %v107_v26 = vpop.permute.xlu0 %106 }
  0x8e   :  { %v112_v27 = vpop.permute.xlu1 %111 }
  0x91   :  { %v1957_v28 = vpop.permute.xlu0 %196 }
  0x92   :  { %v1959_v29 = vpop.permute.xlu1 %201 }
  0x95   :  { %v117_v30 = vpop.permute.xlu0 %116 }
  0x96   :  { %v122_v31 = vpop.permute.xlu1 %121 }
  0x99   :  { %v1961_v32 = vpop.permute.xlu0 %206 }
  0x9a   :  { %v1963_v33 = vpop.permute.xlu1 %211 }
  0x9d   :  { %v127_v34 = vpop.permute.xlu0 %126 }
  0x9e   :  { %v132_v35 = vpop.permute.xlu1 %131 }
  0xa1   :  { %v1965_v36 = vpop.permute.xlu0 %216 }
  0xa2   :  { %v1967_v37 = vpop.permute.xlu1 %221 }
  0xa5   :  { %v137_v38 = vpop.permute.xlu0 %136 }
  0xa6   :  { %v142_v39 = vpop.permute.xlu1 %141 }
  0xa9   :  { %v1969_v40 = vpop.permute.xlu0 %226 }
  0xaa   :  { %v1971_v41 = vpop.permute.xlu1 %231 }
  0xad   :  { %v147_v43 = vpop.permute.xlu0 %146 }
  0xae   :  { %v152_v46 = vpop.permute.xlu1 %151 }
  0xb1   :  { %v1973_v54 = vpop.permute.xlu0 %236 }
  0xb2   :  { %v1977_v59 = vpop.permute.xlu1 %241 }
  0xb5   :  { %v157_v3 = vpop.permute.xlu0 %156 }
  0xb6   :  { %v162_v7 = vpop.permute.xlu1 %161 }
  0xb9   :  { %v1985_v15 = vpop.permute.xlu0 %246 }
  0xba   :  { %v1987_v22 = vpop.permute.xlu1 %251 }
  0xdb   :  { %v1497_v42 = vpop.f32.mrb[0].mxu0 }
  0xdc   :  { %v423_v44 = vpop.f32.mrb[1].mxu0  ;;  %v432_v45 = vadd.f32 %v1497_v42, %v107_v26  ;;  %v167_v42 = vpop.permute.xlu0 %166 }
  0xdd   :  { %v424_v47 = vadd.f32 %v423_v44, %v97_v19  ;;  %v1498_v48 = vpop.f32.mrb[2].mxu0 }
  0xde   :  { %v435_v49 = vadd.f32 %v1498_v48, %v112_v27  ;;  %v426_v50 = vpop.f32.mrb[3].mxu0  ;;  %v552_v52 = vmax.f32 %v432_v45, 0.0 }
  0xdf   :  { %v427_v51 = vadd.f32 %v426_v50, %v102_v21  ;;  %v550_v55 = vmax.f32 %v424_v47, 0.0  ;;  %v172_v47 = vpop.permute.xlu1 %171 }
  0xe0   :  { %v553_v53 = vmax.f32 %v435_v49, 0.0 }
  0xe1   :  { %v551_v56 = vmax.f32 %v427_v51, 0.0 }
  0xe2   :  { %v1975_v57 = vpack.c.bf16 %v553_v53, %v552_v52 }
  0xe3   :  { %v1501_v58 = vpop.f32.mrb[4].mxu0  ;;  %v1979_v60 = vpack.c.bf16 %v551_v56, %v550_v55 }
  0xe4   :  { %v439_v61 = vpop.f32.mrb[5].mxu0  ;;  %v448_v62 = vadd.f32 %v1501_v58, %v127_v34 }
  0xe5   :  { %v440_v63 = vadd.f32 %v439_v61, %v117_v30  ;;  %v1502_v0 = vpop.f32.mrb[6].mxu0 }
  0xe6   :  { %v451_v1 = vadd.f32 %v1502_v0, %v132_v35  ;;  %v442_v2 = vpop.f32.mrb[7].mxu0  ;;  %v556_v5 = vmax.f32 %v448_v62, 0.0 }
  0xe7   :  { %v443_v4 = vadd.f32 %v442_v2, %v122_v31  ;;  %v554_v8 = vmax.f32 %v440_v63, 0.0 }
  0xe8   :  { %v557_v6 = vmax.f32 %v451_v1, 0.0 }
  0xe9   :  { %v555_v9 = vmax.f32 %v443_v4, 0.0 }
  0xea   :  { %v1981_v10 = vpack.c.bf16 %v557_v6, %v556_v5 }
  0xeb   :  { %v1505_v11 = vpop.f32.mrb[8].mxu0  ;;  %v1983_v12 = vpack.c.bf16 %v555_v9, %v554_v8 }
  0xec   :  { %v455_v13 = vpop.f32.mrb[9].mxu0  ;;  %v464_v14 = vadd.f32 %v1505_v11, %v147_v43 }
  0xed   :  { %v456_v16 = vadd.f32 %v455_v13, %v137_v38  ;;  %v1506_v17 = vpop.f32.mrb[10].mxu0 }
  0xee   :  { %v467_v19 = vadd.f32 %v1506_v17, %v152_v46  ;;  %v458_v21 = vpop.f32.mrb[11].mxu0  ;;  %v560_v26 = vmax.f32 %v464_v14, 0.0 }
  0xef   :  { %v459_v23 = vadd.f32 %v458_v21, %v142_v39  ;;  %v558_v30 = vmax.f32 %v456_v16, 0.0 }
  0xf0   :  { %v561_v27 = vmax.f32 %v467_v19, 0.0 }
  0xf1   :  { %v559_v31 = vmax.f32 %v459_v23, 0.0 }
  0xf2   :  { %v1989_v34 = vpack.c.bf16 %v561_v27, %v560_v26 }
  0xf3   :  { %v1509_v35 = vpop.f32.mrb[12].mxu0  ;;  %v1991_v44 = vpack.c.bf16 %v559_v31, %v558_v30 }
  0xf4   :  { %v471_v43 = vpop.f32.mrb[13].mxu0  ;;  %v480_v45 = vadd.f32 %v1509_v35, %v167_v42 }
  0xf5   :  { %v472_v38 = vadd.f32 %v471_v43, %v157_v3  ;;  %v1510_v48 = vpop.f32.mrb[14].mxu0 }
  0xf6   :  { %v483_v46 = vadd.f32 %v1510_v48, %v172_v47  ;;  %v474_v49 = vpop.f32.mrb[15].mxu0  ;;  %v564_v51 = vmax.f32 %v480_v45, 0.0 }
  0xf7   :  { %v475_v50 = vadd.f32 %v474_v49, %v162_v7  ;;  %v562_v52 = vmax.f32 %v472_v38, 0.0 }
  0xf8   :  { %v565_v39 = vmax.f32 %v483_v46, 0.0 }
  0xf9   :  { %v563_v53 = vmax.f32 %v475_v50, 0.0 }
  0xfa   :  { %v1993_v55 = vpack.c.bf16 %v565_v39, %v564_v51 }
  0xfb   :  { %v1513_v56 = vpop.f32.mrb[16].mxu0  ;;  %v1995_v58 = vpack.c.bf16 %v563_v53, %v562_v52  ;;  %v1605_v52 = vld [vmem:[%s2225_s3 + $0x10] ss:$8 sps:$4 sm:$0xff]   ;;  %v1606_v53 = vld [vmem:[%s2225_s3 + $0x60] ss:$8 sps:$4 sm:$0xff]  }
  0xfc   :  { %v487_v61 = vpop.f32.mrb[17].mxu0  ;;  %v496_v62 = vadd.f32 %v1513_v56, %v1953_v24  ;;  %v1609_v56 = vld [vmem:[%s2225_s3 + $0x74] ss:$8 sps:$4 sm:$0xff]  }
  0xfd   :  { %v488_v63 = vadd.f32 %v487_v61, %v1943_v18  ;;  %v1514_v0 = vpop.f32.mrb[18].mxu0  ;;  %v1612_v61 = vld [vmem:[%s2225_s3 + $0x70] ss:$8 sps:$4 sm:$0xff]  }
  0xfe   :  { %v499_v1 = vadd.f32 %v1514_v0, %v1955_v25  ;;  %v490_v2 = vpop.f32.mrb[19].mxu0  ;;  %v568_v4 = vmax.f32 %v496_v62, 0.0  ;;  %v1613_v62 = vld [vmem:[%s2225_s3 + $0x34] ss:$8 sps:$4 sm:$0xff]   ;;  %v1617_v0 = vld [vmem:[%s2225_s3 + $0x30] ss:$8 sps:$4 sm:$0xff]  }
  0xff   :  { %v491_v3 = vadd.f32 %v490_v2, %v1945_v20  ;;  %v566_v6 = vmax.f32 %v488_v63, 0.0  ;;  %v1615_v63 = vld [vmem:[%s2225_s3 + $0x84] ss:$8 sps:$4 sm:$0xff]  }
 0x100   :  { %v569_v5 = vmax.f32 %v499_v1, 0.0  ;;  %v1618_v1 = vld [vmem:[%s2225_s3 + $0x80] ss:$8 sps:$4 sm:$0xff]   ;;  %v1619_v2 = vld [vmem:[%s2225_s3 + $0x44] ss:$8 sps:$4 sm:$0xff]  }
 0x101   :  { %v567_v7 = vmax.f32 %v491_v3, 0.0  ;;  %v1621_v3 = vld [vmem:[%s2225_s3 + $0x94] ss:$8 sps:$4 sm:$0xff]  }
 0x102   :  { %v591_v8 = vpack.c.bf16 %v569_v5, %v568_v4  ;;  %v1623_v4 = vld [vmem:[%s2225_s3 + $0x40] ss:$8 sps:$4 sm:$0xff]   ;;  %v1624_v5 = vld [vmem:[%s2225_s3 + $0x90] ss:$8 sps:$4 sm:$0xff]  }
 0x103   :  { %v1517_v9 = vpop.f32.mrb[20].mxu0  ;;  %v590_v11 = vpack.c.bf16 %v567_v7, %v566_v6  ;;  %v1625_v6 = vld [vmem:[%s2225_s3 + $0xa4] ss:$8 sps:$4 sm:$0xff]   ;;  %v1627_v7 = vld [vmem:[%s2225_s3 + $0xa0] ss:$8 sps:$4 sm:$0xff]  }
 0x104   :  { %v512_v13 = vadd.f32 %v1517_v9, %v1961_v32  ;;  %v503_v14 = vpop.f32.mrb[21].mxu0  ;;  %v1630_v9 = vld [vmem:[%s2225_s3 + $0xb0] ss:$8 sps:$4 sm:$0xff]  }
 0x105   :  { %v504_v24 = vadd.f32 %v503_v14, %v1957_v28  ;;  %v1518_v16 = vpop.f32.mrb[22].mxu0  ;;  %1346 = vmatprep.subr.bf16.mxu0 %v590_v11  ;;  %1559 = vmatprep.subr.bf16.mxu1 %v590_v11  ;;  %v1631_v11 = vld [vmem:[%s2225_s3 + $0xc4] ss:$8 sps:$4 sm:$0xff]   ;;  %v1634_v14 = vld [vmem:[%s2225_s3 + $0xd4] ss:$8 sps:$4 sm:$0xff]  }
 0x106   :  { %v515_v18 = vadd.f32 %v1518_v16, %v1963_v33  ;;  %v506_v25 = vpop.f32.mrb[23].mxu0  ;;  %1347 = vmatpush3.bf16.msra.mxu0 %v1979_v60  ;;  %1567 = vmatpush3.bf16.msra.mxu1 %v1979_v60  ;;  %v572_v17 = vmax.f32 %v512_v13, 0.0  ;;  %v1633_v13 = vld [vmem:[%s2225_s3 + $0xc0] ss:$8 sps:$4 sm:$0xff]   ;;  %v1637_v16 = vld [vmem:[%s2225_s3 + $0xe4] ss:$8 sps:$4 sm:$0xff]  }
 0x107   :  { %v507_v20 = vadd.f32 %v506_v25, %v1959_v29  ;;  %1348 = vmatprep.subr.bf16.mxu0 %v591_v8  ;;  %1560 = vmatprep.subr.bf16.mxu1 %v591_v8  ;;  %v570_v32 = vmax.f32 %v504_v24, 0.0  ;;  %v1628_v8 = vld [vmem:[%s2225_s3 + $0xb4] ss:$8 sps:$4 sm:$0xff]   ;;  %v1636_v24 = vld [vmem:[%s2225_s3 + $0xd0] ss:$8 sps:$4 sm:$0xff]  }
 0x108   :  { %v573_v19 = vmax.f32 %v515_v18, 0.0  ;;  %v1639_v18 = vld [vmem:[%s2225_s3 + $0xe0] ss:$8 sps:$4 sm:$0xff]   ;;  %v1640_v25 = vld [vmem:[%s2225_s3 + $0xf4] ss:$8 sps:$4 sm:$0xff]  }
 0x109   :  { %v571_v21 = vmax.f32 %v507_v20, 0.0  ;;  %v1642_v20 = vld [vmem:[%s2225_s3 + $0xf0] ss:$8 sps:$4 sm:$0xff]  }
 0x10a   :  { %v593_v23 = vpack.c.bf16 %v573_v19, %v572_v17  ;;  %1349 = vmatpush3.bf16.msra.mxu0 %v1975_v57  ;;  %1568 = vmatpush3.bf16.msra.mxu1 %v1975_v57  ;;  %v2119_v17 = vpop.permute.xlu0 %744  ;;  %v2121_v19 = vpop.permute.xlu1 %749 }
 0x10b   :  { %v592_v28 = vpack.c.bf16 %v571_v21, %v570_v32  ;;  %v1521_v33 = vpop.f32.mrb[24].mxu0 }
 0x10c   :  { %v528_v26 = vadd.f32 %v1521_v33, %v1969_v40  ;;  %v519_v29 = vpop.f32.mrb[25].mxu0 }
 0x10d   :  { %v520_v27 = vadd.f32 %v519_v29, %v1965_v36  ;;  %v1522_v30 = vpop.f32.mrb[26].mxu0  ;;  %1350 = vmatprep.subr.bf16.mxu0 %v592_v28  ;;  %1561 = vmatprep.subr.bf16.mxu1 %v592_v28 }
 0x10e   :  { %v531_v60 = vadd.f32 %v1522_v30, %v1971_v41  ;;  %v522_v31 = vpop.f32.mrb[27].mxu0  ;;  %1351 = vmatpush3.bf16.msra.mxu0 %v1983_v12  ;;  %1569 = vmatpush3.bf16.msra.mxu1 %v1983_v12  ;;  %v576_v42 = vmax.f32 %v528_v26, 0.0  ;;  %v665_v32 = vpop.permute.xlu0 %664 }
 0x10f   :  { %v523_v35 = vadd.f32 %v522_v31, %v1967_v37  ;;  %1352 = vmatprep.subr.bf16.mxu0 %v593_v23  ;;  %1562 = vmatprep.subr.bf16.mxu1 %v593_v23  ;;  %v574_v40 = vmax.f32 %v520_v27, 0.0  ;;  %v670_v21 = vpop.permute.xlu1 %669 }
 0x110   :  { %v577_v57 = vmax.f32 %v531_v60, 0.0 }
 0x111   :  { %v575_v43 = vmax.f32 %v523_v35, 0.0  ;;  %v1179_v35 = vlaneseq }
 0x112   :  { %v595_v45 = vpack.c.bf16 %v577_v57, %v576_v42  ;;  %1353 = vmatpush3.bf16.msra.mxu0 %v1981_v10  ;;  %1570 = vmatpush3.bf16.msra.mxu1 %v1981_v10  ;;  %v2123_v23 = vpop.permute.xlu0 %754 }
 0x113   :  { %v594_v36 = vpack.c.bf16 %v575_v43, %v574_v40  ;;  %v1525_v41 = vpop.f32.mrb[28].mxu0  ;;  %v2125_v28 = vpop.permute.xlu1 %759  ;;  %v1180_v42 = vshrl.u32 %v1179_v35, 7 }
 0x114   :  { %v544_v47 = vadd.f32 %v1525_v41, %v1985_v15  ;;  %v535_v37 = vpop.f32.mrb[29].mxu0 }
 0x115   :  { %v536_v38 = vadd.f32 %v535_v37, %v1973_v54  ;;  %v1526_v48 = vpop.f32.mrb[30].mxu0  ;;  %1354 = vmatprep.subr.bf16.mxu0 %v594_v36  ;;  %1563 = vmatprep.subr.bf16.mxu1 %v594_v36  ;;  %v1185_v43 = vsub.s32 1, %v1180_v42  ;;  %v1181_v36 = vsub.s32 0, %v1180_v42 }
 0x116   :  { %v547_v12 = vadd.f32 %v1526_v48, %v1987_v22  ;;  %v538_v46 = vpop.f32.mrb[31].mxu0  ;;  %1355 = vmatpush3.bf16.msra.mxu0 %v1991_v44  ;;  %1571 = vmatpush3.bf16.msra.mxu1 %v1991_v44  ;;  %v580_v50 = vmax.f32 %v544_v47, 0.0  ;;  %v1598_v22 = vld [vmem:[%s2225_s3 + $0x50] ss:$8 sps:$4 sm:$0xff]   ;;  %v1603_v44 = vld [vmem:[%s2225_s3 + $0x64] ss:$8 sps:$4 sm:$0xff]   ;;  %v2127_v33 = vpop.permute.xlu0 %674 }
 0x117   :  { %v539_v49 = vadd.f32 %v538_v46, %v1977_v59  ;;  %1356 = vmatprep.subr.bf16.mxu0 %v595_v45  ;;  %1564 = vmatprep.subr.bf16.mxu1 %v595_v45  ;;  %v578_v15 = vmax.f32 %v536_v38, 0.0  ;;  %v1595_v59 = vld [vmem:[%s2225_s3] ss:$8 sps:$4 sm:$0xff]   ;;  %v2129_v26 = vpop.permute.xlu1 %679 }
 0x118   :  { %v581_v10 = vmax.f32 %v547_v12, 0.0  ;;  %v1175_v45 = vld [vmem:[%s2226_s5] sm:$0x3] }
 0x119   :  { %v579_v51 = vmax.f32 %v539_v49, 0.0  ;;  %v1186_v41 = vrot.slane %v1175_v45, %v1185_v43  ;;  %v2148_v47 = vrot.slane %v1175_v45, %v1181_v36 }
 0x11a   :  { %v597_v39 = vpack.c.bf16 %v581_v10, %v580_v50  ;;  %1357 = vmatpush3.bf16.msra.mxu0 %v1989_v34  ;;  %1572 = vmatpush3.bf16.msra.mxu1 %v1989_v34  ;;  %v1601_v34 = vld [vmem:[%s2225_s3 + $0x14] ss:$8 sps:$4 sm:$0xff]   ;;  %v2131_v29 = vpop.permute.xlu0 %764 }
 0x11b   :  { %v596_v54 = vpack.c.bf16 %v579_v51, %v578_v15  ;;  %v2133_v27 = vpop.permute.xlu1 %769 }
 0x11d   :  { %1358 = vmatprep.subr.bf16.mxu0 %v596_v54  ;;  %1565 = vmatprep.subr.bf16.mxu1 %v596_v54 }
 0x11e   :  { %1359 = vmatpush3.bf16.msra.mxu0 %v1995_v58  ;;  %1573 = vmatpush3.bf16.msra.mxu1 %v1995_v58  ;;  %v1611_v58 = vld [vmem:[%s2225_s3 + $0x20] ss:$8 sps:$4 sm:$0xff]   ;;  %v2135_v30 = vpop.permute.xlu0 %684 }
 0x11f   :  { %1360 = vmatprep.subr.bf16.mxu0 %v597_v39  ;;  %1566 = vmatprep.subr.bf16.mxu1 %v597_v39  ;;  %v2137_v60 = vpop.permute.xlu1 %689 }
 0x122   :  { %1361 = vmatpush3.bf16.msra.mxu0 %v1993_v55  ;;  %1574 = vmatpush3.bf16.msra.mxu1 %v1993_v55  ;;  %v1607_v55 = vld [vmem:[%s2225_s3 + $0x24] ss:$8 sps:$4 sm:$0xff]   ;;  %v2139_v31 = vpop.permute.xlu0 %774 }
 0x123   :  { %v2141_v57 = vpop.permute.xlu1 %779 }
 0x125   :  { %1015 = vmatmul.mubr.bf16.vlgmr.msra.gmra.mrb[32].mxu0 %v1595_v59  ;;  %1055 = vmatmul.mubr.bf16.vlgmr.msra.gmra.mrb[0].mxu1 %v1598_v22 }
 0x126   :  { %1022 = vmatprep.mubr.bf16.mxu0 %v1601_v34  ;;  %1062 = vmatprep.mubr.bf16.mxu1 %v1603_v44  ;;  %v2143_v40 = vpop.permute.xlu0 %694 }
 0x127   :  { %v2150_v37 = vpop.permute.xlu1 %699 }
 0x12a   :  { %v2152_v38 = vpop.permute.xlu0 %784 }
 0x12b   :  { %v2154_v48 = vpop.permute.xlu1 %789 }
 0x12d   :  { %1023 = vmatmul.mubr.bf16.gmra.mrb[36].mxu0 %v1605_v52  ;;  %1063 = vmatmul.mubr.bf16.gmra.mrb[4].mxu1 %v1606_v53 }
 0x12e   :  { %1030 = vmatprep.mubr.bf16.mxu0 %v1607_v55  ;;  %1070 = vmatprep.mubr.bf16.mxu1 %v1609_v56  ;;  %v2156_v12 = vpop.permute.xlu0 %704 }
 0x12f   :  { %v2158_v46 = vpop.permute.xlu1 %709 }
 0x132   :  { %v2160_v49 = vpop.permute.xlu0 %794 }
 0x133   :  { %v2162_v50 = vpop.permute.xlu1 %799 }
 0x135   :  { %1031 = vmatmul.mubr.bf16.gmra.mrb[40].mxu0 %v1611_v58  ;;  %1071 = vmatmul.mubr.bf16.gmra.mrb[8].mxu1 %v1612_v61 }
 0x136   :  { %1038 = vmatprep.mubr.bf16.mxu0 %v1613_v62  ;;  %1078 = vmatprep.mubr.bf16.mxu1 %v1615_v63  ;;  %v715_v10 = vpop.permute.xlu0 %714 }
 0x137   :  { %v720_v15 = vpop.permute.xlu1 %719 }
 0x13a   :  { %v2164_v51 = vpop.permute.xlu0 %804 }
 0x13b   :  { %v2166_v39 = vpop.permute.xlu1 %809 }
 0x13d   :  { %1039 = vmatmul.mubr.bf16.gmra.mrb[44].mxu0 %v1617_v0  ;;  %1079 = vmatmul.mubr.bf16.gmra.mrb[12].mxu1 %v1618_v1 }
 0x13e   :  { %1046 = vmatprep.mubr.bf16.mxu0 %v1619_v2  ;;  %1086 = vmatprep.mubr.bf16.mxu1 %v1621_v3  ;;  %v725_v54 = vpop.permute.xlu0 %724 }
 0x145   :  { %1047 = vmatmul.mubr.bf16.gmra.mrb[48].mxu0 %v1623_v4  ;;  %1087 = vmatmul.mubr.bf16.gmra.mrb[16].mxu1 %v1624_v5  ;;  %v730_v4 = vpop.permute.xlu1 %729  ;;  %v2168_v5 = vpop.permute.xlu0 %814 }
 0x146   :  { %1094 = vmatprep.mubr.bf16.mxu1 %v1625_v6  ;;  %1253 = vmatprep.mubr.f32.mxu0 %v1186_v41 }
 0x14d   :  { %1095 = vmatmul.mubr.bf16.gmra.mrb[20].mxu1 %v1627_v7 }
 0x14e   :  { %1102 = vmatprep.mubr.bf16.mxu1 %v1628_v8 }
 0x155   :  { %1103 = vmatmul.mubr.bf16.gmra.mrb[24].mxu1 %v1630_v9 }
 0x156   :  { %1110 = vmatprep.mubr.bf16.mxu1 %v1631_v11 }
 0x15d   :  { %1111 = vmatmul.mubr.bf16.gmra.mrb[28].mxu1 %v1633_v13 }
 0x15e   :  { %1118 = vmatprep.mubr.bf16.mxu1 %v1634_v14 }
 0x165   :  { %1119 = vmatmul.mubr.bf16.gmra.mrb[32].mxu1 %v1636_v24 }
 0x166   :  { %1126 = vmatprep.mubr.bf16.mxu1 %v1637_v16 }
 0x16d   :  { %1127 = vmatmul.mubr.bf16.gmra.mrb[36].mxu1 %v1639_v18 }
 0x16e   :  { %1134 = vmatprep.mubr.bf16.mxu1 %v1640_v25 }
 0x175   :  { %1135 = vmatmul.mubr.bf16.gmra.mrb[40].mxu1 %v1642_v20 }
 0x1f8   :  { %v1362_v59 = vpop.f32.mrb[32].mxu0  ;;  %v1392_v22 = vpop.f32.mrb[0].mxu1 }
 0x1f9   :  { %v1363_v34 = vpop.f32.mrb[33].mxu0  ;;  %v1393_v44 = vpop.f32.mrb[1].mxu1 }
 0x1fa   :  { %v1364_v52 = vadd.f32 %v1363_v34, %v1362_v59  ;;  %v1394_v53 = vadd.f32 %v1393_v44, %v1392_v22  ;;  %v1365_v55 = vpop.f32.mrb[34].mxu0  ;;  %v1395_v56 = vpop.f32.mrb[2].mxu1 }
 0x1fb   :  { %v1366_v58 = vpop.f32.mrb[35].mxu0  ;;  %v1396_v61 = vpop.f32.mrb[3].mxu1 }
 0x1fc   :  { %v1017_v62 = vadd.f32 %v1364_v52, %v665_v32  ;;  %v1057_v63 = vadd.f32 %v1394_v53, %v715_v10  ;;  %v1367_v0 = vadd.f32 %v1366_v58, %v1365_v55  ;;  %v1397_v1 = vadd.f32 %v1396_v61, %v1395_v56  ;;  %v2176_v59 = vpop.permute.xlu1 %819  ;;  %v735_v22 = vpop.permute.xlu0 %734 }
 0x1fe   :  { %v1020_v2 = vadd.f32 %v1367_v0, %v670_v21  ;;  %v1060_v3 = vadd.f32 %v1397_v1, %v720_v15  ;;  %v1143_v6 = vmax.f32 %v1017_v62, 0.0  ;;  %v1153_v7 = vmax.f32 %v1057_v63, 0.0 }
 0x200   :  { %v1144_v8 = vmax.f32 %v1020_v2, 0.0  ;;  %v1154_v9 = vmax.f32 %v1060_v3, 0.0  ;;  %v1368_v11 = vpop.f32.mrb[36].mxu0  ;;  %v1398_v13 = vpop.f32.mrb[4].mxu1 }
 0x201   :  { %v1369_v14 = vpop.f32.mrb[37].mxu0  ;;  %v1399_v24 = vpop.f32.mrb[5].mxu1 }
 0x202   :  { %v2170_v16 = vpack.c.bf16 %v1144_v8, %v1143_v6  ;;  %v2172_v18 = vpack.c.bf16 %v1154_v9, %v1153_v7  ;;  %v1370_v25 = vadd.f32 %v1369_v14, %v1368_v11  ;;  %v1400_v20 = vadd.f32 %v1399_v24, %v1398_v13  ;;  %v1371_v32 = vpop.f32.mrb[38].mxu0  ;;  %v1401_v21 = vpop.f32.mrb[6].mxu1 }
 0x203   :  { %v1372_v35 = vpop.f32.mrb[39].mxu0  ;;  %v1402_v42 = vpop.f32.mrb[7].mxu1 }
 0x204   :  { %v1025_v43 = vadd.f32 %v1370_v25, %v2127_v33  ;;  %v1065_v45 = vadd.f32 %v1400_v20, %v725_v54  ;;  %v1373_v36 = vadd.f32 %v1372_v35, %v1371_v32  ;;  %v1403_v41 = vadd.f32 %v1402_v42, %v1401_v21  ;;  %v740_v8 = vpop.permute.xlu1 %739 }
 0x206   :  { %v1028_v10 = vadd.f32 %v1373_v36, %v2129_v26  ;;  %v1068_v15 = vadd.f32 %v1403_v41, %v730_v4  ;;  %v1145_v34 = vmax.f32 %v1025_v43, 0.0  ;;  %v1155_v44 = vmax.f32 %v1065_v45, 0.0 }
 0x208   :  { %v1146_v52 = vmax.f32 %v1028_v10, 0.0  ;;  %v1156_v53 = vmax.f32 %v1068_v15, 0.0  ;;  %v1374_v55 = vpop.f32.mrb[40].mxu0  ;;  %v1404_v56 = vpop.f32.mrb[8].mxu1 }
 0x209   :  { %v1375_v58 = vpop.f32.mrb[41].mxu0  ;;  %v1405_v61 = vpop.f32.mrb[9].mxu1 }
 0x20a   :  { %v2178_v62 = vpack.c.bf16 %v1146_v52, %v1145_v34  ;;  %v2180_v33 = vpack.c.bf16 %v1156_v53, %v1155_v44  ;;  %v1376_v54 = vadd.f32 %v1375_v58, %v1374_v55  ;;  %v1406_v63 = vadd.f32 %v1405_v61, %v1404_v56  ;;  %v1377_v0 = vpop.f32.mrb[42].mxu0  ;;  %v1407_v26 = vpop.f32.mrb[10].mxu1 }
 0x20b   :  { %v1378_v1 = vpop.f32.mrb[43].mxu0  ;;  %v1408_v2 = vpop.f32.mrb[11].mxu1 }
 0x20c   :  { %v1033_v3 = vadd.f32 %v1376_v54, %v2135_v30  ;;  %v1073_v4 = vadd.f32 %v1406_v63, %v735_v22  ;;  %v1379_v6 = vadd.f32 %v1378_v1, %v1377_v0  ;;  %v1409_v7 = vadd.f32 %v1408_v2, %v1407_v26 }
 0x20e   :  { %v1036_v9 = vadd.f32 %v1379_v6, %v2137_v60  ;;  %v1076_v11 = vadd.f32 %v1409_v7, %v740_v8  ;;  %v1147_v13 = vmax.f32 %v1033_v3, 0.0  ;;  %v1157_v14 = vmax.f32 %v1073_v4, 0.0 }
 0x210   :  { %v1148_v24 = vmax.f32 %v1036_v9, 0.0  ;;  %v1158_v25 = vmax.f32 %v1076_v11, 0.0  ;;  %v1380_v20 = vpop.f32.mrb[44].mxu0  ;;  %v1410_v32 = vpop.f32.mrb[12].mxu1 }
 0x211   :  { %v1381_v21 = vpop.f32.mrb[45].mxu0  ;;  %v1411_v35 = vpop.f32.mrb[13].mxu1 }
 0x212   :  { %v2184_v42 = vpack.c.bf16 %v1148_v24, %v1147_v13  ;;  %v2186_v43 = vpack.c.bf16 %v1158_v25, %v1157_v14  ;;  %v1382_v30 = vadd.f32 %v1381_v21, %v1380_v20  ;;  %v1412_v45 = vadd.f32 %v1411_v35, %v1410_v32  ;;  %v1383_v36 = vpop.f32.mrb[46].mxu0  ;;  %v1413_v41 = vpop.f32.mrb[14].mxu1 }
 0x213   :  { %v1384_v10 = vpop.f32.mrb[47].mxu0  ;;  %v1414_v15 = vpop.f32.mrb[15].mxu1 }
 0x214   :  { %v1041_v60 = vadd.f32 %v1382_v30, %v2143_v40  ;;  %v1081_v22 = vadd.f32 %v1412_v45, %v2119_v17  ;;  %v1385_v34 = vadd.f32 %v1384_v10, %v1383_v36  ;;  %v1415_v44 = vadd.f32 %v1414_v15, %v1413_v41 }
 0x216   :  { %v1044_v52 = vadd.f32 %v1385_v34, %v2150_v37  ;;  %v1084_v53 = vadd.f32 %v1415_v44, %v2121_v19  ;;  %v1149_v55 = vmax.f32 %v1041_v60, 0.0  ;;  %v1159_v56 = vmax.f32 %v1081_v22, 0.0 }
 0x218   :  { %v1150_v58 = vmax.f32 %v1044_v52, 0.0  ;;  %v1160_v61 = vmax.f32 %v1084_v53, 0.0  ;;  %v1386_v54 = vpop.f32.mrb[48].mxu0  ;;  %v1416_v63 = vpop.f32.mrb[16].mxu1 }
 0x219   :  { %v1387_v0 = vpop.f32.mrb[49].mxu0  ;;  %v1417_v26 = vpop.f32.mrb[17].mxu1 }
 0x21a   :  { %v1541_v1 = vpack.c.bf16 %v1150_v58, %v1149_v55  ;;  %v1388_v2 = vadd.f32 %v1387_v0, %v1386_v54  ;;  %v1418_v3 = vadd.f32 %v1417_v26, %v1416_v63  ;;  %v1389_v40 = vpop.f32.mrb[50].mxu0  ;;  %v1419_v4 = vpop.f32.mrb[18].mxu1  ;;  %v1527_v17 = vpack.c.bf16 %v1160_v61, %v1159_v56 }
 0x21b   :  { %v1390_v6 = vpop.f32.mrb[51].mxu0  ;;  %v1420_v7 = vpop.f32.mrb[19].mxu1 }
 0x21c   :  { %v1049_v37 = vadd.f32 %v1388_v2, %v2156_v12  ;;  %v1089_v19 = vadd.f32 %v1418_v3, %v2123_v23  ;;  %v1391_v8 = vadd.f32 %v1390_v6, %v1389_v40  ;;  %v1421_v9 = vadd.f32 %v1420_v7, %v1419_v4  ;;  %1528 = vmatprep.subr.bf16.mxu0 %v1527_v17 }
 0x21d   :  { %1530 = vmatpush3.bf16.msra.mxu0 %v2170_v16 }
 0x21e   :  { %v1052_v11 = vadd.f32 %v1391_v8, %v2158_v46  ;;  %v1092_v13 = vadd.f32 %v1421_v9, %v2125_v28  ;;  %v1151_v14 = vmax.f32 %v1049_v37, 0.0  ;;  %v1161_v24 = vmax.f32 %v1089_v19, 0.0 }
 0x220   :  { %v1152_v25 = vmax.f32 %v1052_v11, 0.0  ;;  %v1162_v20 = vmax.f32 %v1092_v13, 0.0  ;;  %v1422_v32 = vpop.f32.mrb[20].mxu1 }
 0x221   :  { %v1423_v21 = vpop.f32.mrb[21].mxu1 }
 0x222   :  { %v1545_v35 = vpack.c.bf16 %v1152_v25, %v1151_v14  ;;  %v1424_v30 = vadd.f32 %v1423_v21, %v1422_v32  ;;  %v1425_v12 = vpop.f32.mrb[22].mxu1  ;;  %v1531_v45 = vpack.c.bf16 %v1162_v20, %v1161_v24 }
 0x223   :  { %v1426_v23 = vpop.f32.mrb[23].mxu1 }
 0x224   :  { %v1097_v36 = vadd.f32 %v1424_v30, %v2131_v29  ;;  %v1427_v41 = vadd.f32 %v1426_v23, %v1425_v12  ;;  %1532 = vmatprep.subr.bf16.mxu0 %v1531_v45 }
 0x225   :  { %1534 = vmatpush3.bf16.msra.mxu0 %v2178_v62 }
 0x226   :  { %v1100_v46 = vadd.f32 %v1427_v41, %v2133_v27  ;;  %v1163_v28 = vmax.f32 %v1097_v36, 0.0 }
 0x228   :  { %v1164_v16 = vmax.f32 %v1100_v46, 0.0  ;;  %v1428_v10 = vpop.f32.mrb[24].mxu1 }
 0x229   :  { %v1429_v15 = vpop.f32.mrb[25].mxu1 }
 0x22a   :  { %v1430_v60 = vadd.f32 %v1429_v15, %v1428_v10  ;;  %v1431_v22 = vpop.f32.mrb[26].mxu1  ;;  %v1535_v34 = vpack.c.bf16 %v1164_v16, %v1163_v28  ;;  %v1177_v28 = vstv %s2227_s6 }
 0x22b   :  { %v1432_v44 = vpop.f32.mrb[27].mxu1 }
 0x22c   :  { %v1105_v52 = vadd.f32 %v1430_v60, %v2139_v31  ;;  %v1433_v53 = vadd.f32 %v1432_v44, %v1431_v22  ;;  %1536 = vmatprep.subr.bf16.mxu0 %v1535_v34 }
 0x22d   :  { %1538 = vmatpush3.bf16.msra.mxu0 %v2184_v42 }
 0x22e   :  { %v1108_v29 = vadd.f32 %v1433_v53, %v2141_v57  ;;  %v1165_v55 = vmax.f32 %v1105_v52, 0.0 }
 0x230   :  { %v1166_v62 = vmax.f32 %v1108_v29, 0.0  ;;  %v1434_v56 = vpop.f32.mrb[28].mxu1 }
 0x231   :  { %v1435_v27 = vpop.f32.mrb[29].mxu1 }
 0x232   :  { %v1436_v58 = vadd.f32 %v1435_v27, %v1434_v56  ;;  %v1437_v61 = vpop.f32.mrb[30].mxu1  ;;  %v1539_v54 = vpack.c.bf16 %v1166_v62, %v1165_v55 }
 0x233   :  { %v1438_v63 = vpop.f32.mrb[31].mxu1 }
 0x234   :  { %v1113_v0 = vadd.f32 %v1436_v58, %v2152_v38  ;;  %v1439_v26 = vadd.f32 %v1438_v63, %v1437_v61  ;;  %1540 = vmatprep.subr.bf16.mxu0 %v1539_v54 }
 0x235   :  { %1542 = vmatpush3.bf16.msra.mxu0 %v1541_v1 }
 0x236   :  { %v1116_v31 = vadd.f32 %v1439_v26, %v2154_v48  ;;  %v1167_v2 = vmax.f32 %v1113_v0, 0.0 }
 0x238   :  { %v1168_v3 = vmax.f32 %v1116_v31, 0.0  ;;  %v1440_v42 = vpop.f32.mrb[32].mxu1 }
 0x239   :  { %v1441_v40 = vpop.f32.mrb[33].mxu1 }
 0x23a   :  { %v1442_v57 = vadd.f32 %v1441_v40, %v1440_v42  ;;  %v1443_v4 = vpop.f32.mrb[34].mxu1  ;;  %v1543_v17 = vpack.c.bf16 %v1168_v3, %v1167_v2 }
 0x23b   :  { %v1444_v6 = vpop.f32.mrb[35].mxu1 }
 0x23c   :  { %v1121_v7 = vadd.f32 %v1442_v57, %v2160_v49  ;;  %v1445_v37 = vadd.f32 %v1444_v6, %v1443_v4  ;;  %1544 = vmatprep.subr.bf16.mxu0 %v1543_v17 }
 0x23d   :  { %1546 = vmatpush3.bf16.msra.mxu0 %v1545_v35 }
 0x23e   :  { %v1124_v38 = vadd.f32 %v1445_v37, %v2162_v50  ;;  %v1169_v19 = vmax.f32 %v1121_v7, 0.0 }
 0x240   :  { %v1170_v8 = vmax.f32 %v1124_v38, 0.0  ;;  %v1446_v1 = vpop.f32.mrb[36].mxu1 }
 0x241   :  { %v1447_v9 = vpop.f32.mrb[37].mxu1 }
 0x242   :  { %v1448_v48 = vadd.f32 %v1447_v9, %v1446_v1  ;;  %v1449_v11 = vpop.f32.mrb[38].mxu1  ;;  %v1547_v13 = vpack.c.bf16 %v1170_v8, %v1169_v19 }
 0x243   :  { %v1450_v14 = vpop.f32.mrb[39].mxu1 }
 0x244   :  { %v1129_v24 = vadd.f32 %v1448_v48, %v2164_v51  ;;  %v1451_v25 = vadd.f32 %v1450_v14, %v1449_v11  ;;  %1548 = vmatprep.subr.bf16.mxu0 %v1547_v13 }
 0x245   :  { %1550 = vmatpush3.bf16.msra.mxu0 %v2172_v18 }
 0x246   :  { %v1132_v49 = vadd.f32 %v1451_v25, %v2166_v39  ;;  %v1171_v20 = vmax.f32 %v1129_v24, 0.0 }
 0x248   :  { %v1172_v32 = vmax.f32 %v1132_v49, 0.0  ;;  %v1452_v21 = vpop.f32.mrb[40].mxu1 }
 0x249   :  { %v1453_v50 = vpop.f32.mrb[41].mxu1 }
 0x24a   :  { %v1454_v35 = vadd.f32 %v1453_v50, %v1452_v21  ;;  %v1455_v30 = vpop.f32.mrb[42].mxu1  ;;  %v1551_v12 = vpack.c.bf16 %v1172_v32, %v1171_v20 }
 0x24b   :  { %v1456_v45 = vpop.f32.mrb[43].mxu1 }
 0x24c   :  { %v1137_v23 = vadd.f32 %v1454_v35, %v2168_v5  ;;  %v1457_v36 = vadd.f32 %v1456_v45, %v1455_v30  ;;  %1552 = vmatprep.subr.bf16.mxu0 %v1551_v12 }
 0x24d   :  { %1554 = vmatpush3.bf16.msra.mxu0 %v2180_v33 }
 0x24e   :  { %v1140_v51 = vadd.f32 %v1457_v36, %v2176_v59  ;;  %v1173_v41 = vmax.f32 %v1137_v23, 0.0 }
 0x250   :  { %v1174_v18 = vmax.f32 %v1140_v51, 0.0 }
 0x252   :  { %v1555_v46 = vpack.c.bf16 %v1174_v18, %v1173_v41 }
 0x254   :  { %1556 = vmatprep.subr.bf16.mxu0 %v1555_v46 }
 0x255   :  { %1558 = vmatpush3.bf16.msra.mxu0 %v2186_v43 }
 0x258   :  { %1254 = vmatmul.mubr.f32.vlgmr.msra.gmra.mrb[52].mxu0 %v2148_v47 }
 0x32b   :  { %v1490_v39 = vpop.f32.mrb[52].mxu0 }
 0x32c   :  { %v1491_v5 = vpop.f32.mrb[53].mxu0 }
 0x32d   :  { %v1492_v16 = vadd.f32 %v1491_v5, %v1490_v39 }
 0x32f   :  { %v1256_v10 = vadd.f32 %v1492_v16, %v1177_v28 }
 0x331   :  { %1259 = vst [vmem:[%s2228_s7] sm:$0x1] %v1256_v10 }

</bundles_post_ra>
